<compile_context>
chip_gen: v5e
topology: v5e:2x2
jax: 0.10.0
libtpu: 0.0.40
codegen_flags: <defaults>
</compile_context>

<pallas_src>
import functools

import jax
import jax.numpy as jnp
from jax.experimental import pallas as pl
from jax.experimental.pallas import tpu as pltpu


# ----------------------------------------------------------------------------
# Glue: PyTorch nn.Upsample(mode='nearest') index mapping.
# ----------------------------------------------------------------------------
def _nearest_indices(out_size: int, in_size: int) -> jnp.ndarray:
    # PyTorch 'nearest': src = floor(dst * in_size / out_size), clamped.
    idx = jnp.floor(
        jnp.arange(out_size, dtype=jnp.float32) * (in_size / out_size)
    ).astype(jnp.int32)
    return jnp.clip(idx, 0, in_size - 1)


# ----------------------------------------------------------------------------
# Pass 1: per-image per-class feature sums (K, C) and pixel counts (K, 1).
# Grid (N, T): batch parallel, pixel-tile axis is the reduction ("arbitrary").
# ----------------------------------------------------------------------------
def _ifv_class_sum_kernel(fs_ref, ft_ref, lab_ref,
                          csum_s_ref, csum_t_ref, cnt_ref, *, num_classes: int):
    t = pl.program_id(1)

    @pl.when(t == 0)
    def _init():
        csum_s_ref[...] = jnp.zeros_like(csum_s_ref)
        csum_t_ref[...] = jnp.zeros_like(csum_t_ref)
        cnt_ref[...] = jnp.zeros_like(cnt_ref)

    labels = lab_ref[0]                                        # (1, TP) int32
    tp = labels.shape[1]
    class_ids = jax.lax.broadcasted_iota(jnp.int32, (num_classes, tp), 0)
    onehot = labels == class_ids                               # (K, TP) bool
    onehot_bf = onehot.astype(jnp.bfloat16)                    # exact 0/1 in bf16
    onehot_f32 = onehot.astype(jnp.float32)

    # MXU: contract the lane-dense pixel axis; accumulate in f32.
    dn_nt = (((1,), (1,)), ((), ()))
    csum_s_ref[0] += jax.lax.dot_general(
        onehot_bf, fs_ref[0].astype(jnp.bfloat16), dn_nt,
        preferred_element_type=jnp.float32)                    # (K, Cs)
    csum_t_ref[0] += jax.lax.dot_general(
        onehot_bf, ft_ref[0].astype(jnp.bfloat16), dn_nt,
        preferred_element_type=jnp.float32)                    # (K, Ct)
    # Integer counts accumulated exactly in f32.
    cnt_ref[0] += jnp.sum(onehot_f32, axis=1, keepdims=True)   # (K, 1)


# ----------------------------------------------------------------------------
# Pass 2: cosine(feat, class-center) per pixel without building center planes;
# writes one lane-padded partial sum of squared differences per (image, tile).
# Grid (N, T): both axes parallel.
# ----------------------------------------------------------------------------
def _ifv_cosine_kernel(csum_s_ref, csum_t_ref, cnt_ref,
                       fs_ref, ft_ref, lab_ref, out_ref, *, num_classes: int):
    labels = lab_ref[0]                                        # (1, TP) int32
    tp = labels.shape[1]
    class_ids = jax.lax.broadcasted_iota(jnp.int32, (num_classes, tp), 0)
    onehot = (labels == class_ids).astype(jnp.float32)         # (K, TP)
    in_class = ((labels >= 0) & (labels < num_classes)).astype(jnp.float32)

    # 1/(count + 1e-6) on the tiny (K, 1) counts (EUP approximate reciprocal);
    # applied to the small (K, C) class sums, never to the (K, TP) one-hot.
    inv_cnt = pl.reciprocal(cnt_ref[0] + 1e-6, approx=True)    # (K, 1)

    dn_nn = (((1,), (0,)), ((), ()))                           # (K,C) @ (C,TP)

    def cosine_vs_center(feat_ref, csum_ref):
        feat_f32 = feat_ref[0].astype(jnp.float32)             # (C, TP)
        feat_bf = feat_ref[0].astype(jnp.bfloat16)
        mean = csum_ref[0] * inv_cnt                           # (K, C) f32 means
        # Per-pixel dot with every class mean: full-depth contraction over C.
        dot_all = jax.lax.dot_general(
            mean.astype(jnp.bfloat16), feat_bf, dn_nn,
            preferred_element_type=jnp.float32)                # (K, TP)
        cnorm_sq = jnp.sum(mean * mean, axis=1, keepdims=True)        # (K, 1)
        # Select the labelled class' entries per pixel (K is tiny).
        dot_sel = jnp.sum(onehot * dot_all, axis=0, keepdims=True)    # (1, TP)
        csq_sel = jnp.sum(onehot * cnorm_sq, axis=0, keepdims=True)   # (1, TP)
        naa = jnp.sum(feat_f32 * feat_f32, axis=0, keepdims=True)     # (1, TP)
        # Pixels whose label is outside [0, K) (e.g. ignore=255, padding) keep
        # their own feature as the "center".
        dot_pix = in_class * dot_sel + (1.0 - in_class) * naa
        csq_pix = in_class * csq_sel + (1.0 - in_class) * naa
        # cos = dot / max(||f||*||c||, 1e-8)
        #     = dot * rsqrt(max(||f||^2 * ||c||^2, 1e-16))
        return dot_pix * jax.lax.rsqrt(jnp.maximum(naa * csq_pix, 1e-16))

    d = (cosine_vs_center(fs_ref, csum_s_ref)
         - cosine_vs_center(ft_ref, csum_t_ref))               # (1, TP)
    out_ref[...] = jnp.full(out_ref.shape, jnp.sum(d * d), dtype=jnp.float32)


# ----------------------------------------------------------------------------
# Wrapper.
# ----------------------------------------------------------------------------
def criterion_ifv_pallas(preds_S, preds_T, target, num_classes: int):
    feat_s = preds_S[2]
    feat_t = preds_T[2]            # .detach() is a no-op for the forward pass
    N, Cs, h, w = feat_s.shape
    Nt, Ct, ht, wt = feat_t.shape
    assert N == Nt and (h, w) == (ht, wt)
    K = int(num_classes)
    P = h * w

    # Glue: nearest-resize the integer label map to the feature resolution.
    iy = _nearest_indices(h, target.shape[1])
    ix = _nearest_indices(w, target.shape[2])
    tgt = target[:, iy[:, None], ix[None, :]].astype(jnp.int32).reshape(N, 1, P)

    fs = feat_s.reshape(N, Cs, P)
    ft = feat_t.reshape(N, Ct, P)

    # Pixel tiling: TP is a multiple of 128, sized so one f32 (fs + ft) tile
    # pair stays around 4 MiB (comfortable on v5e/v6e/v7x scoped VMEM).
    LANE = 128
    per_pixel_bytes = (Cs + Ct) * 4
    tp_budget = max(LANE, ((4 << 20) // per_pixel_bytes) // LANE * LANE)
    TP = int(min(1024, tp_budget, -(-P // LANE) * LANE))
    T = -(-P // TP)
    P_pad = T * TP
    if P_pad != P:
        pad = P_pad - P
        # Padded pixels: zero feature + out-of-range label -> contribute 0.
        fs = jnp.pad(fs, ((0, 0), (0, 0), (0, pad)))
        ft = jnp.pad(ft, ((0, 0), (0, 0), (0, pad)))
        tgt = jnp.pad(tgt, ((0, 0), (0, 0), (0, pad)), constant_values=255)

    feat_block_bytes = TP * (Cs * fs.dtype.itemsize + Ct * ft.dtype.itemsize)
    vmem_limit = int(min(56 << 20, max(32 << 20, 4 * feat_block_bytes + (8 << 20))))

    # ---- pass 1: per-image class sums + counts --------------------------------
    pass1 = functools.partial(_ifv_class_sum_kernel, num_classes=K)
    csum_s, csum_t, counts = pl.pallas_call(
        pass1,
        out_shape=(jax.ShapeDtypeStruct((N, K, Cs), jnp.float32),
                   jax.ShapeDtypeStruct((N, K, Ct), jnp.float32),
                   jax.ShapeDtypeStruct((N, K, 1), jnp.float32)),
        grid=(N, T),
        in_specs=[pl.BlockSpec((1, Cs, TP), lambda n, t: (n, 0, t)),
                  pl.BlockSpec((1, Ct, TP), lambda n, t: (n, 0, t)),
                  pl.BlockSpec((1, 1, TP), lambda n, t: (n, 0, t))],
        out_specs=(pl.BlockSpec((1, K, Cs), lambda n, t: (n, 0, 0)),
                   pl.BlockSpec((1, K, Ct), lambda n, t: (n, 0, 0)),
                   pl.BlockSpec((1, K, 1), lambda n, t: (n, 0, 0))),
        compiler_params=pltpu.CompilerParams(
            dimension_semantics=("parallel", "arbitrary"),
            vmem_limit_bytes=vmem_limit),
    )(fs, ft, tgt)

    # ---- pass 2: cosine-vs-center, per-(image, tile) partial SSE --------------
    pass2 = functools.partial(_ifv_cosine_kernel, num_classes=K)
    partials = pl.pallas_call(
        pass2,
        out_shape=jax.ShapeDtypeStruct((N, T, 1, 128), jnp.float32),
        grid=(N, T),
        in_specs=[pl.BlockSpec((1, K, Cs), lambda n, t: (n, 0, 0)),
                  pl.BlockSpec((1, K, Ct), lambda n, t: (n, 0, 0)),
                  pl.BlockSpec((1, K, 1), lambda n, t: (n, 0, 0)),
                  pl.BlockSpec((1, Cs, TP), lambda n, t: (n, 0, t)),
                  pl.BlockSpec((1, Ct, TP), lambda n, t: (n, 0, t)),
                  pl.BlockSpec((1, 1, TP), lambda n, t: (n, 0, t))],
        out_specs=pl.BlockSpec((1, 1, 1, 128), lambda n, t: (n, t, 0, 0)),
        compiler_params=pltpu.CompilerParams(
            dimension_semantics=("parallel", "parallel"),
            vmem_limit_bytes=vmem_limit),
    )(csum_s, csum_t, counts, fs, ft, tgt)

    # Padded pixels contribute exactly 0; divide by the true pixel count.
    return jnp.sum(partials[:, :, 0, 0]) / (N * P)


# ----------------------------------------------------------------------------
# Pure-JAX reference (mirrors the PyTorch module) for validation.
# ----------------------------------------------------------------------------
def _criterion_ifv_ref(feat_s, feat_t, target, num_classes):
    N, C, h, w = feat_s.shape
    iy = _nearest_indices(h, target.shape[1])
    ix = _nearest_indices(w, target.shape[2])
    tar = target[:, iy[:, None], ix[None, :]].astype(jnp.float32)   # (N, h, w)
    tar_s = jnp.broadcast_to(tar[:, None], feat_s.shape)
    tar_t = jnp.broadcast_to(tar[:, None], feat_t.shape)

    center_s = feat_s
    center_t = feat_t
    for i in range(num_classes):
        m_s = (tar_s == i).astype(jnp.float32)
        m_t = (tar_t == i).astype(jnp.float32)
        mean_s = (m_s * feat_s).sum(-1).sum(-1) / (m_s.sum(-1).sum(-1) + 1e-6)
        mean_t = (m_t * feat_t).sum(-1).sum(-1) / (m_t.sum(-1).sum(-1) + 1e-6)
        center_s = (1 - m_s) * center_s + m_s * mean_s[..., None, None]
        center_t = (1 - m_t) * center_t + m_t * mean_t[..., None, None]

    def cos(a, b):
        dot = (a * b).sum(1)
        na = jnp.sqrt((a * a).sum(1))
        nb = jnp.sqrt((b * b).sum(1))
        return dot / jnp.maximum(na * nb, 1e-8)

    ps = cos(feat_s, center_s)
    pt = cos(feat_t, center_t)
    return jnp.mean((ps - pt) ** 2)


if __name__ == "__main__":
    key = jax.random.PRNGKey(0)
    k1, k2, k3, k4 = jax.random.split(key, 4)

    N = 2
    C_feat = 32           # feature channels
    h, w = 16, 16         # feature spatial size -> P = 256 (lane-dense)
    H, W = 32, 32         # label-map resolution
    num_classes = 4

    feat_S = jax.random.normal(k1, (N, C_feat, h, w), dtype=jnp.float32)
    feat_T = jax.random.normal(k2, (N, C_feat, h, w), dtype=jnp.float32)
    target = jax.random.randint(k3, (N, H, W), 0, num_classes).astype(jnp.int32)
    # sprinkle some ignore-label pixels, as in real segmentation targets
    ignore = jax.random.uniform(k4, (N, H, W)) < 0.1
    target = jnp.where(ignore, 255, target)

    preds_S = (None, None, feat_S)   # the module only reads index 2
    preds_T = (None, None, feat_T)

    out = criterion_ifv_pallas(preds_S, preds_T, target, num_classes)
    out = jax.block_until_ready(out)

    ref = jax.block_until_ready(
        _criterion_ifv_ref(feat_S, feat_T, target, num_classes))
    # bf16 MXU operands inside the kernel -> slightly looser tolerance than
    # the pure-f32 reference (accumulation stays f32).
    assert jnp.allclose(out, ref, rtol=3e-2, atol=2e-3), (out, ref)

    print("KERNEL_OK")
</pallas_src>

<mosaic_0001>
module attributes {stable_mosaic.version = 11 : i64} {
  func.func @_ifv_class_sum_kernel(%arg0: i32, %arg1: i32, %arg2: memref<1x32x256xf32, #tpu.memory_space<vmem>>, %arg3: memref<1x32x256xf32, #tpu.memory_space<vmem>>, %arg4: memref<1x1x256xi32, #tpu.memory_space<vmem>>, %arg5: memref<1x4x32xf32, #tpu.memory_space<vmem>>, %arg6: memref<1x4x32xf32, #tpu.memory_space<vmem>>, %arg7: memref<1x4x1xf32, #tpu.memory_space<vmem>>) attributes {dimension_semantics = [#tpu.dimension_semantics<parallel>, #tpu.dimension_semantics<arbitrary>], iteration_bounds = array<i64: 2, 1>, scalar_prefetch = 0 : i64, scratch_operands = 0 : i64, tpu.core_type = #tpu.core_type<tc>, window_params = [{transform_indices = @transform_0, window_bounds = array<i64: 1, 32, 256>}, {transform_indices = @transform_1, window_bounds = array<i64: 1, 32, 256>}, {transform_indices = @transform_2, window_bounds = array<i64: 1, 1, 256>}, {transform_indices = @transform_3, window_bounds = array<i64: 1, 4, 32>}, {transform_indices = @transform_4, window_bounds = array<i64: 1, 4, 32>}, {transform_indices = @transform_5, window_bounds = array<i64: 1, 4, 1>}]} {
    %c0_i32 = arith.constant 0 : i32
    %0 = arith.cmpi eq, %arg1, %c0_i32 : i32
    %1 = arith.extui %0 : i1 to i32
    %c0_i32_0 = arith.constant 0 : i32
    %2 = arith.cmpi ne, %1, %c0_i32_0 : i32
    scf.if %2 {
      %cst_29 = arith.constant 0.000000e+00 : f32
      %41 = vector.broadcast %cst_29 : f32 to vector<1x4x32xf32>
      %c0_30 = arith.constant 0 : index
      %c0_31 = arith.constant 0 : index
      %c0_32 = arith.constant 0 : index
      %42 = vector.load %arg5[%c0_30, %c0_31, %c0_32] : memref<1x4x32xf32, #tpu.memory_space<vmem>>, vector<1x4x32xf32>
      tpu.vector_store %arg5[%c0_30, %c0_31, %c0_32], %41 {strides = array<i32>} : memref<1x4x32xf32, #tpu.memory_space<vmem>>, vector<1x4x32xf32>,
      %cst_33 = arith.constant 0.000000e+00 : f32
      %43 = vector.broadcast %cst_33 : f32 to vector<1x4x32xf32>
      %c0_34 = arith.constant 0 : index
      %c0_35 = arith.constant 0 : index
      %c0_36 = arith.constant 0 : index
      %44 = vector.load %arg6[%c0_34, %c0_35, %c0_36] : memref<1x4x32xf32, #tpu.memory_space<vmem>>, vector<1x4x32xf32>
      tpu.vector_store %arg6[%c0_34, %c0_35, %c0_36], %43 {strides = array<i32>} : memref<1x4x32xf32, #tpu.memory_space<vmem>>, vector<1x4x32xf32>,
      %cst_37 = arith.constant 0.000000e+00 : f32
      %45 = vector.broadcast %cst_37 : f32 to vector<1x4x1xf32>
      %c0_38 = arith.constant 0 : index
      %c0_39 = arith.constant 0 : index
      %c0_40 = arith.constant 0 : index
      %46 = vector.load %arg7[%c0_38, %c0_39, %c0_40] : memref<1x4x1xf32, #tpu.memory_space<vmem>>, vector<1x4x1xf32>
      tpu.vector_store %arg7[%c0_38, %c0_39, %c0_40], %45 {strides = array<i32>} : memref<1x4x1xf32, #tpu.memory_space<vmem>>, vector<1x4x1xf32>,
    } else {
    }
    %c0 = arith.constant 0 : index
    %c0_1 = arith.constant 0 : index
    %c0_2 = arith.constant 0 : index
    %3 = vector.load %arg4[%c0, %c0_1, %c0_2] : memref<1x1x256xi32, #tpu.memory_space<vmem>>, vector<1x1x256xi32>
    %4 = vector.shape_cast %3 : vector<1x1x256xi32> to vector<1x256xi32>
    %5 = tpu.iota {dimensions = array<i32: 0>} : vector<4x256xi32>
    %6 = vector.broadcast %4 : vector<1x256xi32> to vector<4x256xi32>
    %7 = arith.cmpi eq, %6, %5 : vector<4x256xi32>
    %8 = arith.extui %7 : vector<4x256xi1> to vector<4x256xi32>
    %9 = arith.sitofp %8 : vector<4x256xi32> to vector<4x256xf32>
    %10 = arith.truncf %9 : vector<4x256xf32> to vector<4x256xbf16>
    %11 = arith.extui %7 : vector<4x256xi1> to vector<4x256xi32>
    %12 = arith.sitofp %11 : vector<4x256xi32> to vector<4x256xf32>
    %c0_3 = arith.constant 0 : index
    %c0_4 = arith.constant 0 : index
    %c0_5 = arith.constant 0 : index
    %13 = vector.load %arg5[%c0_3, %c0_4, %c0_5] : memref<1x4x32xf32, #tpu.memory_space<vmem>>, vector<1x4x32xf32>
    %14 = vector.shape_cast %13 : vector<1x4x32xf32> to vector<4x32xf32>
    %c0_6 = arith.constant 0 : index
    %c0_7 = arith.constant 0 : index
    %c0_8 = arith.constant 0 : index
    %15 = vector.load %arg2[%c0_6, %c0_7, %c0_8] : memref<1x32x256xf32, #tpu.memory_space<vmem>>, vector<1x32x256xf32>
    %16 = vector.shape_cast %15 : vector<1x32x256xf32> to vector<32x256xf32>
    %17 = arith.truncf %16 : vector<32x256xf32> to vector<32x256xbf16>
    %cst = arith.constant dense<0.000000e+00> : vector<4x32xf32>
    %18 = tpu.matmul %10, %17, %cst {dimension_numbers = #tpu.dot_dimension_numbers<[1], [1], [0], [0], [0, 0, 1, 0], [], []>} : vector<4x256xbf16>, vector<32x256xbf16>, vector<4x32xf32> -> vector<4x32xf32>
    %19 = arith.addf %14, %18 : vector<4x32xf32>
    %c0_9 = arith.constant 0 : index
    %c0_10 = arith.constant 0 : index
    %c0_11 = arith.constant 0 : index
    %20 = vector.load %arg5[%c0_9, %c0_10, %c0_11] : memref<1x4x32xf32, #tpu.memory_space<vmem>>, vector<1x4x32xf32>
    %21 = vector.shape_cast %20 : vector<1x4x32xf32> to vector<4x32xf32>
    %22 = vector.shape_cast %19 : vector<4x32xf32> to vector<1x4x32xf32>
    tpu.vector_store %arg5[%c0_9, %c0_10, %c0_11], %22 {strides = array<i32>} : memref<1x4x32xf32, #tpu.memory_space<vmem>>, vector<1x4x32xf32>,
    %c0_12 = arith.constant 0 : index
    %c0_13 = arith.constant 0 : index
    %c0_14 = arith.constant 0 : index
    %23 = vector.load %arg6[%c0_12, %c0_13, %c0_14] : memref<1x4x32xf32, #tpu.memory_space<vmem>>, vector<1x4x32xf32>
    %24 = vector.shape_cast %23 : vector<1x4x32xf32> to vector<4x32xf32>
    %c0_15 = arith.constant 0 : index
    %c0_16 = arith.constant 0 : index
    %c0_17 = arith.constant 0 : index
    %25 = vector.load %arg3[%c0_15, %c0_16, %c0_17] : memref<1x32x256xf32, #tpu.memory_space<vmem>>, vector<1x32x256xf32>
    %26 = vector.shape_cast %25 : vector<1x32x256xf32> to vector<32x256xf32>
    %27 = arith.truncf %26 : vector<32x256xf32> to vector<32x256xbf16>
    %cst_18 = arith.constant dense<0.000000e+00> : vector<4x32xf32>
    %28 = tpu.matmul %10, %27, %cst_18 {dimension_numbers = #tpu.dot_dimension_numbers<[1], [1], [0], [0], [0, 0, 1, 0], [], []>} : vector<4x256xbf16>, vector<32x256xbf16>, vector<4x32xf32> -> vector<4x32xf32>
    %29 = arith.addf %24, %28 : vector<4x32xf32>
    %c0_19 = arith.constant 0 : index
    %c0_20 = arith.constant 0 : index
    %c0_21 = arith.constant 0 : index
    %30 = vector.load %arg6[%c0_19, %c0_20, %c0_21] : memref<1x4x32xf32, #tpu.memory_space<vmem>>, vector<1x4x32xf32>
    %31 = vector.shape_cast %30 : vector<1x4x32xf32> to vector<4x32xf32>
    %32 = vector.shape_cast %29 : vector<4x32xf32> to vector<1x4x32xf32>
    tpu.vector_store %arg6[%c0_19, %c0_20, %c0_21], %32 {strides = array<i32>} : memref<1x4x32xf32, #tpu.memory_space<vmem>>, vector<1x4x32xf32>,
    %c0_22 = arith.constant 0 : index
    %c0_23 = arith.constant 0 : index
    %c0_24 = arith.constant 0 : index
    %33 = vector.load %arg7[%c0_22, %c0_23, %c0_24] : memref<1x4x1xf32, #tpu.memory_space<vmem>>, vector<1x4x1xf32>
    %34 = vector.shape_cast %33 : vector<1x4x1xf32> to vector<4x1xf32>
    %cst_25 = arith.constant dense<0.000000e+00> : vector<4xf32>
    %35 = vector.multi_reduction <add>, %12, %cst_25 [1] : vector<4x256xf32> to vector<4xf32>
    %36 = vector.shape_cast %35 : vector<4xf32> to vector<4x1xf32>
    %37 = arith.addf %34, %36 : vector<4x1xf32>
    %c0_26 = arith.constant 0 : index
    %c0_27 = arith.constant 0 : index
    %c0_28 = arith.constant 0 : index
    %38 = vector.load %arg7[%c0_26, %c0_27, %c0_28] : memref<1x4x1xf32, #tpu.memory_space<vmem>>, vector<1x4x1xf32>
    %39 = vector.shape_cast %38 : vector<1x4x1xf32> to vector<4x1xf32>
    %40 = vector.shape_cast %37 : vector<4x1xf32> to vector<1x4x1xf32>
    tpu.vector_store %arg7[%c0_26, %c0_27, %c0_28], %40 {strides = array<i32>} : memref<1x4x1xf32, #tpu.memory_space<vmem>>, vector<1x4x1xf32>,
    return
  }
  func.func @transform_0(%arg0: i32, %arg1: i32) -> (i32, i32, i32) {
    %c0_i32 = arith.constant 0 : i32
    %c0_i32_0 = arith.constant 0 : i32
    return %arg0, %c0_i32, %arg1 : i32, i32, i32
  }
  func.func @transform_1(%arg0: i32, %arg1: i32) -> (i32, i32, i32) {
    %c0_i32 = arith.constant 0 : i32
    %c0_i32_0 = arith.constant 0 : i32
    return %arg0, %c0_i32, %arg1 : i32, i32, i32
  }
  func.func @transform_2(%arg0: i32, %arg1: i32) -> (i32, i32, i32) {
    %c0_i32 = arith.constant 0 : i32
    %c0_i32_0 = arith.constant 0 : i32
    return %arg0, %c0_i32, %arg1 : i32, i32, i32
  }
  func.func @transform_3(%arg0: i32, %arg1: i32) -> (i32, i32, i32) {
    %c0_i32 = arith.constant 0 : i32
    %c0_i32_0 = arith.constant 0 : i32
    %c0_i32_1 = arith.constant 0 : i32
    return %arg0, %c0_i32, %c0_i32_0 : i32, i32, i32
  }
  func.func @transform_4(%arg0: i32, %arg1: i32) -> (i32, i32, i32) {
    %c0_i32 = arith.constant 0 : i32
    %c0_i32_0 = arith.constant 0 : i32
    %c0_i32_1 = arith.constant 0 : i32
    return %arg0, %c0_i32, %c0_i32_0 : i32, i32, i32
  }
  func.func @transform_5(%arg0: i32, %arg1: i32) -> (i32, i32, i32) {
    %c0_i32 = arith.constant 0 : i32
    %c0_i32_0 = arith.constant 0 : i32
    %c0_i32_1 = arith.constant 0 : i32
    return %arg0, %c0_i32, %c0_i32_0 : i32, i32, i32
  }
}

</mosaic_0001>

<bundles_post_ra>
// kernel: tpu_custom_call.1
= control target key start
LH: loop header
LB: loop body
LE: loop exit
PB: predicated region body
PF: predicated region fallthrough
CT: control target
= control target key end

     0   :  { %s1294_s0 = inlined_call_operand.hbm [shape: f32[2,32,256], index: 0, kind: input, shape index: {}]   ;;  %s1295_s1 = inlined_call_operand.hbm [shape: f32[2,32,256], index: 1, kind: input, shape index: {}]   ;;  %s1296_s2 = inlined_call_operand.hbm [shape: s32[2,1,256], index: 2, kind: input, shape index: {}]   ;;  %s1297_s3 = inlined_call_operand.hbm [shape: f32[2,4,32], index: 3, kind: output, shape index: {0}]   ;;  %s1298_s4 = inlined_call_operand.hbm [shape: f32[2,4,32], index: 4, kind: output, shape index: {1}]   ;;  %s1299_s5 = inlined_call_operand.vmem [shape: f32[2,4,1], index: 5, kind: output, shape index: {2}]  }
   0x1   :  { %1310 = sst [smem:[#allocation22_spill]] %s1295_s1 }
   0x2   :  { %1311 = sst [smem:[#allocation23_spill]] %s1297_s3 }
   0x3   :  { %1312 = sst [smem:[#allocation24_spill]] %s1298_s4 }
   0x4   :  { %11 = vsyncpa [#allocation3], 0 }
   0x5   :  { %13 = vsyncpa [#allocation3 + $0x1], 0 }
   0x6   :  { %14 = vsyncpa [#allocation6], 0 }
   0x7   :  { %16 = vsyncpa [#allocation6 + $0x1], 0 }
   0x8   :  { %17 = vsyncpa [#allocation4], 0 }
   0x9   :  { %19 = vsyncpa [#allocation4 + $0x1], 0 }
   0xa   :  { %20 = vsyncpa [#allocation10], 0 }
   0xb   :  { %22 = vsyncpa [#allocation10 + $0x1], 0  ;;  %s1077_s18 = smov 0   ;;  %s1079_s19 = smov 0  }
   0xc   :  { %s1081_s20 = smov 0   ;;  %s1083_s21 = smov 0  }
   0xd   :  { %s1085_s22 = smov 0   ;;  %s1087_s23 = smov 0  }
   0xe LB: > { %1313 = sst [smem:[#allocation15_spill]] %s1021_s18  ;;  %s1108_s24 = sadd.s32 4294967295, %s1041_s23   ;;  %s1041_s23 = sphi %s1087_s23, %s28_s23   ;;  %s1037_s22 = sphi %s1085_s22, %s1344_s22   ;;  %s1033_s21 = sphi %s1083_s21, %s1343_s21   ;;  %s1029_s20 = sphi %s1081_s20, %s1339_s20   ;;  %s1025_s19 = sphi %s1079_s19, %s1342_s19   ;;  %s1021_s18 = sphi %s1077_s18, %s1341_s18  }
   0xf   : > { %1314 = sst [smem:[#allocation16_spill]] %s1029_s20  ;;  %s716_s25 = sadd.s32 4294967294, %s1041_s23  }
  0x10   : > { %1315 = sst [smem:[#allocation17_spill]] %s1041_s23  ;;  %s40_s26 = sadd.s32 1, %s1037_s22 }
  0x11   : > { %s49_s27 = sadd.s32 1, %s1029_s20  ;;  %p42_p0 = scmp.ge.s32.totalorder %s40_s26, 2 }
  0x12   : > { %p56_p1 = scmp.ne.s32.totalorder %s1029_s20, %s1025_s19  ;;  %p57_p2 = scmp.eq.s32.totalorder %s1041_s23, 0 }
  0x13   : > { %p62_p3 = scmp.ne.s32.totalorder %s1025_s19, %s1021_s18  ;;  %s1346_s26 = smov (%p42_p0, %s40_s26), 0 }
  0x14   : > { %1316 = sst [smem:[#allocation18_spill]] %s1346_s26  ;;  %p1120_p4 = por %p57_p2, %p56_p1 }
  0x15   : > { %p63_p5 = scmp.eq.s32.totalorder %s1108_s24, 0  ;;  %s44_s29 = ssub.s32 %s1037_s22, %s1346_s26 }
  0x16   : > { %p142_p6 = scmp.eq.s32.totalorder %s1108_s24, 1  ;;  %p47_p7 = scmp.eq.s32.totalorder %s44_s29, 0 }
  0x17   : > { %p1128_p8 = por %p63_p5, %p62_p3  ;;  %p148_p10 = scmp.eq.s32.totalorder %s716_s25, 1 }
  0x18   : > { %p1132_p9 = por %p142_p6, %p56_p1  ;;  %p718_p12 = scmp.ge.s32.totalorder %s1041_s23, 2 }
  0x19   : > { %s1137_s7 = scalar_select %p47_p7, %s1029_s20, %s49_s27  }
  0x1a   : > { %s1319_s6 = scalar_select %p1132_p9, 1, 0 }
  0x1b   : > { %1321 = sst [smem:[#allocation20_spill]] %s1137_s7  ;;  %p1139_p11 = por %p148_p10, %p62_p3 }
  0x1c   : > { %1320 = sst [smem:[#allocation19_spill]] %s1319_s6  ;;  %p779_p13 = scmp.lt.s32.totalorder %s1041_s23, 2 }
  0x1d   : > { %s1322_s8 = scalar_select %p1139_p11, 1, 0 }
  0x1e   : > { %s1146_s9 = sand.u32 1, %s1029_s20   ;;  %s750_s11 = sshll.u32 %s1037_s22, 6 }
  0x1f   : > { %1323 = sst [smem:[#allocation21_spill]] %s1322_s8  ;;  %s719_s10 = sshll.u32 %s1146_s9, 6 }
  0x20   : > { %p1152_p0 = pnand %p779_p13, %p1120_p4  ;;  %s244_s13 = sand.u32 1, %s1041_s23  }
  0x21   : > { %s1325_s1 = sld [smem:[#allocation22_spill]]  ;;  %s248_s25 = scalar_lea.vmem [#allocation5], %s719_s10 }
  0x22   : > { %s258_s27 = sshll.u32 %s248_s25, 4  ;;  %s245_s29 = scalar_lea.sflag [#allocation6], %s244_s13  ;;  %s259_s27 = int_to_ptr.vmem [resolvable:$true] %s258_s27 }
  0x23   : > { %s1043_s28 = smov 256   ;;  %s1044_s26 = smov 16  }
  0x24   : > { %p727_p1 = scmp.ge.s32.totalorder %s1041_s23, 1  ;;  %p287_p2 = scmp.lt.s32.totalorder %s1041_s23, 3 }
  0x25   : > { %s221_s13 = scalar_lea.sflag [#allocation3], %s1146_s9 }
  0x26   : > { %p1164_p3 = pnand %p727_p1, %p287_p2 }
  0x27   : > { %s255_s16 = scalar_lea.hbm %s1325_s1, %s750_s11  ;;  %s224_s1 = scalar_lea.vmem [#allocation2], %s719_s10 }
  0x28   : > { %s256_s17 = sshll.u32 %s255_s16, 4  ;;  %s231_s16 = scalar_lea.hbm %s1294_s0, %s750_s11  ;;  %s257_s17 = int_to_ptr.hbm [resolvable:$true] %s256_s17 }
  0x29   : > { %768 = dma.hbm_to_vmem [thread:$0]  (!%p1152_p0), %s257_s17, 1024, %s259_s27, %s245_s29, %s1043_s28, %s1043_s28, %s1044_s26  }
  0x2a   : > { %s232_s25 = sshll.u32 %s231_s16, 4  ;;  %s234_s20 = sshll.u32 %s224_s1, 4  ;;  %s233_s25 = int_to_ptr.hbm [resolvable:$true] %s232_s25  ;;  %s235_s20 = int_to_ptr.vmem [resolvable:$true] %s234_s20 }
  0x2b   : > { %765 = dma.hbm_to_vmem [thread:$0]  (!%p1152_p0), %s233_s25, 1024, %s235_s20, %s221_s13, %s1043_s28, %s1043_s28, %s1044_s26  }
  0x2c   : > { %s725_s17 = sshll.u32 %s1146_s9, 1  ;;  %s726_s27 = sshll.u32 %s1037_s22, 1 }
  0x2d   : > { %s278_s18 = scalar_lea.hbm %s1296_s2, %s726_s27  ;;  %s272_s6 = scalar_lea.vmem [#allocation7], %s725_s17 }
  0x2e   : > { %s280_s4 = sshll.u32 %s278_s18, 4  ;;  %s282_s3 = sshll.u32 %s272_s6, 4  ;;  %s281_s4 = int_to_ptr.hbm [resolvable:$true] %s280_s4  ;;  %s283_s3 = int_to_ptr.vmem [resolvable:$true] %s282_s3 }
  0x2f   : > { %771 = dma.hbm_to_vmem [thread:$0]  (!%p1152_p0), %s281_s4, 32, %s283_s3, %s245_s29  }
  0x30   : > { %291 = sbr.rel (%p1164_p3) target bundleno = 224 (0xe0), region = 32  ;;  %s1184_s1 = sand.u32 (!%p1164_p3), 1, %s1025_s19  }
  0x31   : > { %s728_s20 = sshll.u32 (!%p1164_p3), %s1184_s1, 6  ;;  %s294_s26 = scalar_lea.sflag (!%p1164_p3), [#allocation3], %s1184_s1 }
  0x32   : > { %s297_s23 = scalar_lea.vmem (!%p1164_p3), [#allocation2], %s728_s20 }
  0x35   : > { %1004 = dma.done.wait (%p1128_p8), %s294_s26, 1024  }
  0x36   : > { %1006 = vsyncadd (%p1128_p8), %s294_s26, 4294966272  ;;  %s303_s3 = sand.u32 1, %s1108_s24   ;;  %s1193_s18 = scalar_lea.vmem [#allocation5], %s728_s20 }
  0x37   : > { %s304_s4 = scalar_lea.sflag [#allocation6], %s303_s3 }
  0x38   : > { %1008 = dma.done.wait (%p1128_p8), %s304_s4, 1056  }
  0x39   : > { %1010 = vsyncadd (%p1128_p8), %s304_s4, 4294966240  ;;  %s730_s6 = sshll.u32 %s1184_s1, 1  ;;  %v399_v0 = vld [vmem:[%s297_s23 + $0x20] sm:$0xff]  ;;  %v401_v1 = vld [vmem:[%s297_s23 + $0x30] sm:$0xff]  ;;  %v382_v3 = vlaneseq  ;;  %vm478_vm0 = vcmask 1043456   ;;  %v1045_v31 = vmov 0.0  }
  0x3a   : > { %v400_v2 = vld [vmem:[%s297_s23 + $0x28] sm:$0xff]  ;;  %v405_v4 = vpack.c.bf16 %v401_v1, %v399_v0  ;;  %v402_v5 = vld [vmem:[%s297_s23 + $0x38] sm:$0xff]  ;;  %v441_v6 = vld [vmem:[%s1193_s18 + $0x20] sm:$0xff]  ;;  %s317_s24 = scalar_lea.vmem [#allocation7], %s730_s6  ;;  %v1046_v37 = vmov 1.0|1.0  }
  0x3b   : > { %v443_v7 = vld [vmem:[%s1193_s18 + $0x30] sm:$0xff]  ;;  %v406_v8 = vpack.c.bf16 %v402_v5, %v400_v2  ;;  %v442_v10 = vld [vmem:[%s1193_s18 + $0x28] sm:$0xff]  ;;  %v444_v11 = vld [vmem:[%s1193_s18 + $0x38] sm:$0xff]  ;;  %v383_v17 = vshrl.u32 %v382_v3, 7  ;;  %p367_p4 = scmp.lt.s32.totalorder %s1033_s21, 1  ;;  %s731_s30 = sshll.u32 %s1184_s1, 2 }
  0x3c   : > { %v447_v9 = vpack.c.bf16 %v443_v7, %v441_v6  ;;  %413 = vmatpush.bf16.xpose.msra.mxu0 %v405_v4  ;;  %v448_v12 = vpack.c.bf16 %v444_v11, %v442_v10  ;;  %v395_v13 = vld [vmem:[%s297_s23] sm:$0xff]  ;;  %v397_v14 = vld [vmem:[%s297_s23 + $0x10] sm:$0xff]  ;;  %v396_v15 = vld [vmem:[%s297_s23 + $0x8] sm:$0xff]  ;;  %vm376_vm5 = vcmask 257024   ;;  %s350_s9 = scalar_lea.vmem [#allocation8], %s731_s30  ;;  %s1230_s10 = scalar_lea.vmem [#allocation9], %s731_s30 }
  0x3d   : > { %426 = vmatpush.bf16.xpose.msra.mxu1 %v406_v8  ;;  %v398_v16 = vld [vmem:[%s297_s23 + $0x18] sm:$0xff]  ;;  %v437_v18 = vld [vmem:[%s1193_s18] sm:$0xff]  ;;  %v439_v19 = vld [vmem:[%s1193_s18 + $0x10] sm:$0xff]  ;;  %v403_v25 = vpack.c.bf16 %v397_v14, %v395_v13  ;;  %s368_s7 = scalar_select %p367_p4, %s1033_s21, 1  ;;  %377 = vst.msk [vmem:[%s350_s9] sm:$0xf] %vm376_vm5, %v1045_v31 }
  0x3e   : > { %455 = vmatpush.bf16.xpose.msra.mxu2 %v447_v9  ;;  %468 = vmatpush.bf16.xpose.msra.mxu3 %v448_v12  ;;  %v381_v20 = vld [vmem:[%s317_s24] sm:$0x3]  ;;  %v438_v21 = vld [vmem:[%s1193_s18 + $0x8] sm:$0xff]  ;;  %v440_v22 = vld [vmem:[%s1193_s18 + $0x18] sm:$0xff]  ;;  %v404_v26 = vpack.c.bf16 %v398_v16, %v396_v15  ;;  %v445_v27 = vpack.c.bf16 %v439_v19, %v437_v18  ;;  %378 = vst.msk [vmem:[%s1230_s10] sm:$0xf] %vm376_vm5, %v1045_v31 }
  0x3f   : > { %v384_v23 = vperm.slane %v381_v20, 0  ;;  %v385_v24 = vperm.slane %v381_v20, 1  ;;  %v446_v30 = vpack.c.bf16 %v440_v22, %v438_v21  ;;  %s733_s8 = sshll.u32 %s368_s7, 2  ;;  %vm379_vm6 = vcmask 3072   ;;  %s746_s28 = sshll.u32 %s1033_s21, 2 }
  0x40   : > { %s370_s29 = scalar_lea.vmem %s1299_s5, %s733_s8  ;;  %s1331_s16 = sld [smem:[#allocation23_spill]] }
  0x41   : > { %vm1208_vm1 = vcmp.eq.s32.totalorder %v384_v23, %v383_v17  ;;  %vm1212_vm2 = vcmp.eq.s32.totalorder %v385_v24, %v383_v17  ;;  %380 = vst.msk [vmem:[%s370_s29] sm:$0xf] %vm379_vm6, %v1045_v31  ;;  %s509_s17 = sshll.u32 %s350_s9, 4  ;;  %s1333_s23 = sld [smem:[#allocation24_spill]]  ;;  %s510_s17 = int_to_ptr.vmem [resolvable:$true] %s509_s17 }
  0x42   : > { %v734_v32 = vsel %vm1208_vm1, 1.0, %v1045_v31  ;;  %v735_v33 = vsel %vm1212_vm2, 1.0, %v1045_v31  ;;  %vm736_vm3 = vmpackc.low %vm1208_vm1, %vm1208_vm1  ;;  %s488_s21 = scalar_lea.sflag [#allocation4], %s1184_s1 }
  0x43   : > { %v479_v34 = vsel %vm478_vm0, %v734_v32, 0.0  ;;  %v480_v35 = vsel %vm478_vm0, %v735_v33, 0.0  ;;  %vm738_vm4 = vmpackc.low %vm1212_vm2, %vm1212_vm2 }
  0x44   : > { %414 = vmatpush.bf16.xpose.msra.mxu0 %v403_v25  ;;  %v481_v36 = vadd.f32 %v480_v35, %v479_v34  ;;  %v394_v42 = vld [vmem:[%s350_s9] sm:$0xf] }
  0x45   : > { %427 = vmatpush.bf16.xpose.msra.mxu1 %v404_v26 }
  0x46   : > { %456 = vmatpush.bf16.xpose.msra.mxu2 %v445_v27  ;;  %469 = vmatpush.bf16.xpose.msra.mxu3 %v446_v30  ;;  %s507_s25 = scalar_lea.hbm %s1331_s16, %s746_s28  ;;  %s943_s7 = scalar_lea.hbm %s1331_s16, 8 }
  0x47   : > { %482 = vadd.xlane.f32.xlu0 %v481_v36  ;;  %s511_s27 = sshll.u32 %s507_s25, 4  ;;  %s1334_s3 = smov %s1333_s23  ;;  %s512_s27 = int_to_ptr.hbm [resolvable:$true] %s511_s27 }
  0x48   : > { %v477_v38 = vld [vmem:[%s370_s29] sm:$0xf]  ;;  %s521_s4 = scalar_lea.hbm %s1333_s23, %s746_s28  ;;  %s937_s18 = sshra.s32 %s512_s27, 4  ;;  %s938_s18 = int_to_ptr.hbm [resolvable:$true] %s937_s18 }
  0x49   : > { %s939_s6 = scalar_lea.hbm %s938_s18, 4  ;;  %p944_p8 = scmp.lt.s32.totalorder %s938_s18, %s1331_s16 }
  0x4a   : > { %p940_p5 = scmp.ne.s32.totalorder %s938_s18, %s939_s6  ;;  %p945_p10 = scmp.lt.s32.totalorder %s943_s7, %s939_s6 }
  0x4b   : > { %737 = vmatmul.msk.bf16.vlgmr.msra.gmra.mxu0 %vm736_vm3, %v1046_v37 }
  0x4c   : > { %739 = vmatmul.msk.bf16.vlgmr.msra.gmra.mxu1 %vm738_vm4, %v1046_v37  ;;  %p941_p6 = pnand %p940_p5, %p1132_p9  ;;  %p946_p13 = por %p945_p10, %p944_p8 }
  0x4d   : > { %741 = vmatmul.msk.bf16.vlgmr.msra.gmra.mxu2 %vm736_vm3, %v1046_v37  ;;  %743 = vmatmul.msk.bf16.vlgmr.msra.gmra.mxu3 %vm738_vm4, %v1046_v37 }
  0x4e   : > { %p942_p7 = pneg %p941_p6 }
  0x50   : > { %p947_p0 = pnand %p946_p13, %p942_p7 }
  0xba   : > { %v483_v39 = vpop.xlane.xlu0 %482 }
  0xbb   : > { %v484_v40 = vadd.f32 %v483_v39, %v477_v38 }
  0xbd   : > { %486 = vst.msk [vmem:[%s370_s29] sm:$0xf] %vm379_vm6, %v484_v40 }
  0xc8   : > { %v416_v41 = vpop.f32.mrf.mxu0 }
  0xc9   : > { %v429_v43 = vpop.f32.mrf.mxu1 }
  0xca   : > { %v430_v44 = vadd.f32 %v429_v43, %v416_v41 }
  0xcc   : > { %v433_v45 = vadd.f32 %v430_v44, %v394_v42 }
  0xce   : > { %435 = vst.msk [vmem:[%s350_s9] sm:$0xf] %vm376_vm5, %v433_v45 }
  0xd0   : > { %v458_v46 = vpop.f32.mrf.mxu2 }
  0xd1   : > { %950 = shalt.err (!%p947_p0)
}
  0xd2   : > { %758 = dma.vmem_to_hbm [thread:$0]  (%p1132_p9), %s510_s17, 64, %s512_s27, %s488_s21   ;;  %v436_v47 = vld [vmem:[%s1230_s10] sm:$0xf]  ;;  %v471_v48 = vpop.f32.mrf.mxu3  ;;  %v418_v49 = vpop.f32.mrf.mxu0 }
  0xd3   : > { %s523_s9 = sshll.u32 %s1230_s10, 4  ;;  %s525_s12 = sshll.u32 %s521_s4, 4  ;;  %v472_v50 = vadd.f32 %v471_v48, %v458_v46  ;;  %v431_v51 = vpop.f32.mrf.mxu1  ;;  %s524_s9 = int_to_ptr.vmem [resolvable:$true] %s523_s9  ;;  %s526_s12 = int_to_ptr.hbm [resolvable:$true] %s525_s12 }
  0xd4   : > { %s493_s29 = scalar_lea.sflag [#allocation10], %s1184_s1  ;;  %s965_s28 = sshra.s32 %s526_s12, 4  ;;  %s966_s28 = int_to_ptr.hbm [resolvable:$true] %s965_s28 }
  0xd5   : > { %v475_v52 = vadd.f32 %v472_v50, %v436_v47  ;;  %s967_s14 = scalar_lea.hbm %s966_s28, 4  ;;  %s971_s17 = scalar_lea.hbm %s1334_s3, 8 }
  0xd6   : > { %p968_p1 = scmp.ne.s32.totalorder %s966_s28, %s967_s14  ;;  %p972_p4 = scmp.lt.s32.totalorder %s966_s28, %s1334_s3 }
  0xd7   : > { %476 = vst.msk [vmem:[%s1230_s10] sm:$0xf] %vm376_vm5, %v475_v52  ;;  %p973_p5 = scmp.lt.s32.totalorder %s971_s17, %s967_s14 }
  0xd8   : > { %p969_p2 = pnand %p968_p1, %p1132_p9 }
  0xd9   : > { %p974_p6 = por %p973_p5, %p972_p4 }
  0xda   : > { %p970_p3 = pneg %p969_p2 }
  0xdc   : > { %p975_p7 = pnand %p974_p6, %p970_p3 }
  0xde   : > { %978 = shalt.err (!%p975_p7)
}
  0xdf   : > { %759 = dma.vmem_to_hbm [thread:$0]  (%p1132_p9), %s524_s9, 64, %s526_s12, %s493_s29   ;;  %v460_v53 = vpop.f32.mrf.mxu2  ;;  %v473_v54 = vpop.f32.mrf.mxu3 }
  0xe0 PF: > { %s1335_s1 = sld [smem:[#allocation15_spill]]  ;;  %p773_p8 = pnand %p718_p12, %p1139_p11 }
  0xe1   : > { %s1337_s26 = sld [smem:[#allocation17_spill]] }
  0xe2   : > { %p774_p10 = pneg %p773_p8 }
  0xe6   : > { %s540_s23 = sand.u32 1, %s1335_s1  }
  0xe7   : > { %s541_s4 = scalar_lea.sflag [#allocation4], %s540_s23 }
  0xe8   : > { %1012 = dma.done.wait (%p774_p10), %s541_s4, 64  }
  0xe9   : > { %1014 = vsyncadd (%p774_p10), %s541_s4, 4294967232  ;;  %s551_s21 = scalar_lea.sflag [#allocation10], %s540_s23 }
  0xea   : > { %1016 = dma.done.wait (%p774_p10), %s551_s21, 64  }
  0xeb   : > { %1018 = vsyncadd (%p774_p10), %s551_s21, 4294967232  ;;  %s28_s23 = sadd.s32 1, %s1337_s26   ;;  %s1338_s13 = sld [smem:[#allocation16_spill]] }
  0xec   : > { %p25_p9 = scmp.ge.s32.totalorder %s28_s23, 4   ;;  %s1339_s20 = sld [smem:[#allocation20_spill]] }
  0xed   : > { %s1340_s6 = sld [smem:[#allocation18_spill]]  ;;  %s1341_s18 = smov %s1025_s19 }
  0xee   : > { %s1343_s21 = smov %s1037_s22 }
  0xef   :  { %27 = sbr.rel (!%p25_p9) target bundleno = 14 (0xe), region = 134 }
  0xf1   : > { %s1342_s19 = smov %s1338_s13 }
  0xf3   : > { %s1344_s22 = smov %s1340_s6 }
  0xf4   :  { %564 = vsyncpa [#allocation3], 1 }
  0xf5   :  { %566 = vsyncpa [#allocation3 + $0x1], 1 }
  0xf6   :  { %567 = vsyncpa [#allocation6], 1 }
  0xf7   :  { %569 = vsyncpa [#allocation6 + $0x1], 1 }
  0xf8   :  { %570 = vsyncpa [#allocation4], 1 }
  0xf9   :  { %572 = vsyncpa [#allocation4 + $0x1], 1 }
  0xfa   :  { %573 = vsyncpa [#allocation10], 1 }
  0xfb   :  { %575 = vsyncpa [#allocation10 + $0x1], 1 }

</bundles_post_ra>
